<compile_context>
chip_gen: v5e
topology: v5e:2x2
jax: 0.10.0
libtpu: 0.0.40
codegen_flags: <defaults>
</compile_context>

<pallas_src>
import functools

import jax
import jax.numpy as jnp
from jax.experimental import pallas as pl
from jax.experimental.pallas import tpu as pltpu


def _round_up(x, m):
    return (x + m - 1) // m * m


def _largest_tile(n_pad, cap):
    """Largest multiple of 128 that divides n_pad (itself a multiple of 128) and is <= cap."""
    cap = max(128, min(cap, n_pad))
    cap -= cap % 128
    for t in range(cap, 0, -128):
        if n_pad % t == 0:
            return t
    return 128


def _vmem_cap_bytes():
    try:
        return int(pltpu.get_tpu_info().vmem_capacity_bytes)
    except Exception:
        return 64 * 1024 * 1024  # assume v7x (smallest) if query unavailable


# ----------------------------- kernels --------------------------------------


def _support_kernel(x_ref, w_ref, o_ref):
    # support tile = x_tile @ W   (MXU, f32 accumulation, cast to output dtype)
    o_ref[...] = jnp.dot(
        x_ref[...], w_ref[...], preferred_element_type=jnp.float32
    ).astype(o_ref.dtype)


def _make_aggregate_kernel(resident, tk):
    """grid = (row tiles [parallel], adj-column tiles [arbitrary reduction])."""

    def kernel(adj_ref, sup_ref, inv_norm_ref, b_ref, o_ref, acc_ref):
        k = pl.program_id(1)

        if resident:
            # support lives fully in VMEM: slice the (tk, Fpad) window for this k.
            start = pl.multiple_of(k * tk, 128)
            sup = sup_ref[pl.ds(start, tk), :]
        else:
            sup = sup_ref[...]

        # Native bf16 x bf16 (or f32 x f32) MXU dot with f32 accumulation.
        prod = jnp.dot(adj_ref[...], sup, preferred_element_type=jnp.float32)

        @pl.when(k == 0)
        def _first():
            acc_ref[...] = prod          # no separate zero-init pass

        @pl.when(k > 0)
        def _accum():
            acc_ref[...] += prod

        @pl.when(k == pl.num_programs(1) - 1)
        def _finalize():
            out = acc_ref[...] * inv_norm_ref[...] + b_ref[...]
            o_ref[...] = jax.nn.sigmoid(out).astype(o_ref.dtype)

    return kernel


# ----------------------------- wrapper ---------------------------------------


def _stage2_vmem_bytes(tm, tk, n_pad, f_pad, adj_isz, sup_isz, resident):
    adj = 2 * tm * tk * adj_isz                                   # double-buffered adj tile
    sup = 2 * (n_pad * f_pad if resident else tk * f_pad) * sup_isz
    out = 2 * tm * f_pad * 4
    inv = 2 * tm * 128 * 4                                        # (tm,1) lane-pads to 128
    bias = 2 * 8 * f_pad * 4
    acc = tm * f_pad * 4
    return adj + sup + out + inv + bias + acc


def gcn_layer_v1(x, adj, weight, bias=None, norm=None, *,
                 precision="bf16", row_tile=None, col_tile=None):
    """Pallas implementation of GCNLayer_v1.forward.

    x:      (N, in_features)   float32
    adj:    (N, N)             dense adjacency
    weight: (in_features, out_features)
    bias:   (out_features,) or None
    norm:   (N, 1) / (N,) or None
    precision: "bf16" (default; adj/support fed to MXU in bf16, f32 accumulation)
               or "f32" (exact path).
    row_tile / col_tile: optional caps on the stage-2 tile sizes (testing/tuning).
    """
    assert precision in ("bf16", "f32")
    N, Fin = x.shape
    Fout = weight.shape[1]
    assert adj.shape == (N, N)
    assert weight.shape[0] == Fin

    f32 = jnp.float32
    mxu_dtype = jnp.bfloat16 if precision == "bf16" else f32
    adj_isz = jnp.dtype(mxu_dtype).itemsize
    sup_isz = adj_isz

    Fpad = _round_up(Fout, 128)       # lane-dense output / MXU N-dim
    Fin_pad = _round_up(Fin, 128)     # full MXU K-dim for stage 1
    Np = _round_up(N, 128)            # 128-aligned rows/cols (no-op pad when aligned)

    # ----- per-generation VMEM budget & tile selection ------------------------
    vmem_cap = _vmem_cap_bytes()
    vmem_limit = min(int(vmem_cap * 0.85), 110 * 1024 * 1024)
    budget = int(vmem_limit * 0.9)

    big_vmem = vmem_cap >= 96 * 1024 * 1024            # v5e / v6e (128 MiB)
    tm_cap = row_tile if row_tile is not None else (2048 if big_vmem else 1024)
    tk_cap = col_tile if col_tile is not None else (4096 if big_vmem else 2048)

    # Keep support fully resident in VMEM whenever it takes <1/3 of the budget.
    sup_total = Np * Fpad * sup_isz
    resident = (2 * sup_total) <= budget // 3

    tm = _largest_tile(Np, tm_cap)
    tk = _largest_tile(Np, tk_cap)
    while (_stage2_vmem_bytes(tm, tk, Np, Fpad, adj_isz, sup_isz, resident) > budget
           and (tm > 128 or tk > 128)):
        if tk >= tm and tk > 128:
            tk = _largest_tile(Np, tk // 2)
        elif tm > 128:
            tm = _largest_tile(Np, tm // 2)
        else:
            break

    # ----- host-side prep (pads are no-ops for aligned shapes) ----------------
    x_p = jnp.pad(x.astype(f32), ((0, Np - N), (0, Fin_pad - Fin)))
    w_p = jnp.pad(weight.astype(f32), ((0, Fin_pad - Fin), (0, Fpad - Fout)))
    adj_p = jnp.pad(adj.astype(mxu_dtype), ((0, Np - N), (0, Np - N)))
    if bias is not None:
        b_p = jnp.pad(bias.reshape(1, Fout).astype(f32), ((0, 0), (0, Fpad - Fout)))
    else:
        b_p = jnp.zeros((1, Fpad), f32)
    if norm is not None:
        inv_norm = 1.0 / norm.reshape(N, 1).astype(f32)
        inv_norm_p = jnp.pad(inv_norm, ((0, Np - N), (0, 0)), constant_values=1.0)
    else:
        inv_norm_p = jnp.ones((Np, 1), f32)

    # -------- stage 1: support = x @ W  (computed once) -----------------------
    t1 = _largest_tile(Np, tm_cap)
    support = pl.pallas_call(
        _support_kernel,
        out_shape=jax.ShapeDtypeStruct((Np, Fpad), mxu_dtype),
        grid_spec=pltpu.PrefetchScalarGridSpec(
            num_scalar_prefetch=0,
            grid=(Np // t1,),
            in_specs=[
                pl.BlockSpec((t1, Fin_pad), lambda i: (i, 0)),
                pl.BlockSpec((Fin_pad, Fpad), lambda i: (0, 0)),   # weight resident
            ],
            out_specs=pl.BlockSpec((t1, Fpad), lambda i: (i, 0)),
        ),
        compiler_params=pltpu.CompilerParams(
            dimension_semantics=("parallel",),
            vmem_limit_bytes=vmem_limit,
        ),
    )(x_p, w_p)

    # -------- stage 2: sigmoid(adj @ support * inv_norm + bias) ---------------
    grid = (Np // tm, Np // tk)

    if resident:
        sup_spec = pl.BlockSpec((Np, Fpad), lambda i, k: (0, 0))   # resident, DMA'd once
        sup_stream_bytes = Np * Fpad * sup_isz
    else:
        sup_spec = pl.BlockSpec((tk, Fpad), lambda i, k: (k, 0))   # streamed per step
        sup_stream_bytes = grid[0] * Np * Fpad * sup_isz

    cost = pl.CostEstimate(
        flops=2 * Np * Np * Fpad,
        transcendentals=Np * Fpad,
        bytes_accessed=(adj_p.size * adj_isz + sup_stream_bytes
                        + Np * Fpad * 4 + Np * 4 + Fpad * 4),
    )

    out_p = pl.pallas_call(
        _make_aggregate_kernel(resident, tk),
        out_shape=jax.ShapeDtypeStruct((Np, Fpad), f32),
        grid_spec=pltpu.PrefetchScalarGridSpec(
            num_scalar_prefetch=0,
            grid=grid,
            in_specs=[
                pl.BlockSpec((tm, tk), lambda i, k: (i, k)),       # adj tile (streamed)
                sup_spec,                                          # support
                pl.BlockSpec((tm, 1), lambda i, k: (i, 0)),        # inv_norm
                pl.BlockSpec((1, Fpad), lambda i, k: (0, 0)),      # bias (resident)
            ],
            out_specs=pl.BlockSpec((tm, Fpad), lambda i, k: (i, 0)),
            scratch_shapes=[pltpu.VMEM((tm, Fpad), jnp.float32)],
        ),
        compiler_params=pltpu.CompilerParams(
            dimension_semantics=("parallel", "arbitrary"),
            vmem_limit_bytes=vmem_limit,
        ),
        cost_estimate=cost,
    )(adj_p, support, inv_norm_p, b_p)

    return out_p[:N, :Fout]


# ----------------------------- reference -------------------------------------


def reference_gcn(x, adj, weight, bias=None, norm=None):
    support = x @ weight
    out = adj @ support
    if norm is not None:
        out = out / norm
    if bias is not None:
        out = out + bias
    return jax.nn.sigmoid(out)


# ----------------------------- demo / test -----------------------------------

if __name__ == "__main__":
    key = jax.random.PRNGKey(0)
    k_x, k_adj, k_w, k_b, k_n = jax.random.split(key, 5)

    N, Fin, Fout = 256, 64, 32
    stdv = 1.0 / (Fout ** 0.5)

    x = jax.random.normal(k_x, (N, Fin), dtype=jnp.float32)
    adj = (jax.random.uniform(k_adj, (N, N)) < 0.1).astype(jnp.float32)  # 0/1 adjacency
    weight = jax.random.uniform(k_w, (Fin, Fout), minval=-stdv, maxval=stdv,
                                dtype=jnp.float32)
    bias = jax.random.uniform(k_b, (Fout,), minval=-stdv, maxval=stdv,
                              dtype=jnp.float32)
    norm = jax.random.uniform(k_n, (N, 1), minval=0.5, maxval=2.0, dtype=jnp.float32)

    # 1) default bf16 MXU path (no norm) -- loose tolerance (support quantized to bf16)
    out = jax.block_until_ready(gcn_layer_v1(x, adj, weight, bias=bias))
    ref = reference_gcn(x, adj, weight, bias=bias)
    assert out.shape == (N, Fout)
    assert jnp.allclose(out, ref, atol=3e-2, rtol=3e-2), "mismatch (bf16, no norm)"

    # 2) exact f32 path with norm -- tight tolerance
    out_n = jax.block_until_ready(
        gcn_layer_v1(x, adj, weight, bias=bias, norm=norm, precision="f32"))
    ref_n = reference_gcn(x, adj, weight, bias=bias, norm=norm)
    assert jnp.allclose(out_n, ref_n, atol=2e-5, rtol=2e-5), "mismatch (f32, norm)"

    # 3) ragged / multi-tile path: N=320 (-> padded 384), Fin=48, Fout=40, forced
    #    128-tiles -> stage-2 grid (3, 3); exercises accumulator first/accumulate/
    #    finalize phases and the pad/slice handling.  f32 for a tight check.
    N2, Fin2, Fout2 = 320, 48, 40
    k2 = jax.random.split(jax.random.PRNGKey(1), 4)
    x2 = jax.random.normal(k2[0], (N2, Fin2), dtype=jnp.float32)
    adj2 = (jax.random.uniform(k2[1], (N2, N2)) < 0.05).astype(jnp.float32)
    w2 = jax.random.uniform(k2[2], (Fin2, Fout2), minval=-0.2, maxval=0.2,
                            dtype=jnp.float32)
    b2 = jax.random.uniform(k2[3], (Fout2,), minval=-0.2, maxval=0.2,
                            dtype=jnp.float32)
    ref2 = reference_gcn(x2, adj2, w2, bias=b2)

    out2_f32 = jax.block_until_ready(
        gcn_layer_v1(x2, adj2, w2, bias=b2, precision="f32",
                     row_tile=128, col_tile=128))
    assert out2_f32.shape == (N2, Fout2)
    assert jnp.allclose(out2_f32, ref2, atol=2e-5, rtol=2e-5), "mismatch (tiled f32)"

    out2_bf16 = jax.block_until_ready(
        gcn_layer_v1(x2, adj2, w2, bias=b2, row_tile=128, col_tile=128))
    assert jnp.allclose(out2_bf16, ref2, atol=3e-2, rtol=3e-2), "mismatch (tiled bf16)"

    # 4) no-bias path
    out_nb = jax.block_until_ready(gcn_layer_v1(x, adj, weight, bias=None,
                                                precision="f32"))
    ref_nb = reference_gcn(x, adj, weight, bias=None)
    assert jnp.allclose(out_nb, ref_nb, atol=2e-5, rtol=2e-5), "mismatch (no bias)"

    print("KERNEL_OK")
</pallas_src>

<mosaic_0001>
module attributes {stable_mosaic.version = 11 : i64} {
  func.func @_support_kernel(%arg0: i32, %arg1: memref<256x128xf32, #tpu.memory_space<vmem>>, %arg2: memref<128x128xf32, #tpu.memory_space<vmem>>, %arg3: memref<256x128xbf16, #tpu.memory_space<vmem>>) attributes {dimension_semantics = [#tpu.dimension_semantics<parallel>], iteration_bounds = array<i64: 1>, scalar_prefetch = 0 : i64, scratch_operands = 0 : i64, tpu.core_type = #tpu.core_type<tc>, window_params = [{transform_indices = @transform_0, window_bounds = array<i64: 256, 128>}, {pipeline_mode = #tpu.pipeline_mode<synchronous>, transform_indices = @transform_1, window_bounds = array<i64: 128, 128>}, {transform_indices = @transform_2, window_bounds = array<i64: 256, 128>}]} {
    %c0 = arith.constant 0 : index
    %c0_0 = arith.constant 0 : index
    %0 = vector.load %arg1[%c0, %c0_0] : memref<256x128xf32, #tpu.memory_space<vmem>>, vector<256x128xf32>
    %c0_1 = arith.constant 0 : index
    %c0_2 = arith.constant 0 : index
    %1 = vector.load %arg2[%c0_1, %c0_2] : memref<128x128xf32, #tpu.memory_space<vmem>>, vector<128x128xf32>
    %cst = arith.constant dense<0.000000e+00> : vector<256x128xf32>
    %2 = tpu.matmul %0, %1, %cst {dimension_numbers = #tpu.dot_dimension_numbers<[1], [0], [0], [1], [0, 0, 1, 1], [], []>} : vector<256x128xf32>, vector<128x128xf32>, vector<256x128xf32> -> vector<256x128xf32>
    %3 = arith.truncf %2 : vector<256x128xf32> to vector<256x128xbf16>
    %c0_3 = arith.constant 0 : index
    %c0_4 = arith.constant 0 : index
    %4 = vector.load %arg3[%c0_3, %c0_4] : memref<256x128xbf16, #tpu.memory_space<vmem>>, vector<256x128xbf16>
    tpu.vector_store %arg3[%c0_3, %c0_4], %3 {strides = array<i32>} : memref<256x128xbf16, #tpu.memory_space<vmem>>, vector<256x128xbf16>,
    return
  }
  func.func @transform_0(%arg0: i32) -> (i32, i32) {
    %c0_i32 = arith.constant 0 : i32
    %c0_i32_0 = arith.constant 0 : i32
    return %arg0, %c0_i32 : i32, i32
  }
  func.func @transform_1(%arg0: i32) -> (i32, i32) {
    %c0_i32 = arith.constant 0 : i32
    %c0_i32_0 = arith.constant 0 : i32
    %c0_i32_1 = arith.constant 0 : i32
    return %c0_i32, %c0_i32_0 : i32, i32
  }
  func.func @transform_2(%arg0: i32) -> (i32, i32) {
    %c0_i32 = arith.constant 0 : i32
    %c0_i32_0 = arith.constant 0 : i32
    return %arg0, %c0_i32 : i32, i32
  }
}

</mosaic_0001>

<bundles_post_ra>
// kernel: tpu_custom_call.1
= control target key start
LH: loop header
LB: loop body
LE: loop exit
PB: predicated region body
PF: predicated region fallthrough
CT: control target
= control target key end

     0   :  { %7 = vsyncpa [#allocation3], 0  ;;  %s548_s0 = inlined_call_operand.hbm [shape: f32[256,128], index: 0, kind: input, shape index: {}]   ;;  %s549_s1 = inlined_call_operand.hbm [shape: f32[128,128], index: 1, kind: input, shape index: {}]   ;;  %s550_s2 = inlined_call_operand.hbm [shape: bf16[256,128], index: 2, kind: output, shape index: {}]  }
   0x1   :  { %8 = vsyncpa [#allocation6], 0 }
   0x2   :  { %9 = vsyncpa [#allocation4], 0  ;;  %s14_s11 = sshll.u32 %s548_s0, 4  ;;  %s517_s12 = smov [#allocation2]   ;;  %s15_s11 = int_to_ptr.hbm [resolvable:$true] %s14_s11 }
   0x3   :  { %s16_s13 = sshll.u32 %s517_s12, 4  ;;  %s27_s16 = sshll.u32 %s549_s1, 4  ;;  %s17_s13 = int_to_ptr.vmem [resolvable:$true] %s16_s13  ;;  %s28_s16 = int_to_ptr.hbm [resolvable:$true] %s27_s16 }
   0x4   :  { %s518_s17 = smov 128   ;;  %s519_s18 = smov 8  }
   0x5   :  { %22 = dma.hbm_to_vmem [thread:$0]  %s15_s11, 4096, %s17_s13, [#allocation3], %s518_s17, %s518_s17, %s519_s18  }
   0x6   :  { %s520_s19 = smov [#allocation5]  }
   0x7   :  { %s29_s20 = sshll.u32 %s520_s19, 4  ;;  %s30_s20 = int_to_ptr.vmem [resolvable:$true] %s29_s20 }
   0x8   :  { %35 = dma.hbm_to_vmem [thread:$0]  %s28_s16, 2048, %s30_s20, [#allocation6], %s518_s17, %s518_s17, %s519_s18  }
   0x9   :  { %511 = dma.done.wait [#allocation3], 4096  }
   0xa   :  { %512 = vsyncadd [#allocation3], 4294963200 }
   0xb   :  { %513 = dma.done.wait [#allocation6], 2048  }
   0xc   :  { %514 = vsyncadd [#allocation6], 4294965248  ;;  %v91_v0 = vld [vmem:[#allocation5 + $0x78] sm:$0xff]  ;;  %v90_v1 = vld [vmem:[#allocation5 + $0x70] sm:$0xff]  ;;  %s521_s0 = smov [#allocation7]   ;;  %s275_s23 = sshll.u32 %s550_s2, 4  ;;  %s276_s23 = int_to_ptr.hbm [resolvable:$true] %s275_s23 }
   0xd   :  { %92 = vmatpush.msra.mxu0 %v91_v0  ;;  %384 = vmatpush.msra.mxu1 %v91_v0  ;;  %v89_v2 = vld [vmem:[#allocation5 + $0x68] sm:$0xff]  ;;  %v88_v3 = vld [vmem:[#allocation5 + $0x60] sm:$0xff]  ;;  %v87_v4 = vld [vmem:[#allocation5 + $0x58] sm:$0xff]  ;;  %s273_s1 = sshll.u32 %s521_s0, 4  ;;  %s522_s24 = smov 64   ;;  %s274_s1 = int_to_ptr.vmem [resolvable:$true] %s273_s1 }
   0xe   :  { %385 = vmatpush.msra.mxu2 %v91_v0  ;;  %386 = vmatpush.msra.mxu3 %v91_v0  ;;  %v86_v5 = vld [vmem:[#allocation5 + $0x50] sm:$0xff]  ;;  %v85_v6 = vld [vmem:[#allocation5 + $0x48] sm:$0xff]  ;;  %v84_v7 = vld [vmem:[#allocation5 + $0x40] sm:$0xff]  ;;  %s523_s25 = smov 4  }
   0xf   :  { %93 = vmatpush.msra.mxu0 %v90_v1  ;;  %387 = vmatpush.msra.mxu1 %v90_v1  ;;  %v83_v8 = vld [vmem:[#allocation5 + $0x38] sm:$0xff]  ;;  %v82_v9 = vld [vmem:[#allocation5 + $0x30] sm:$0xff]  ;;  %v81_v10 = vld [vmem:[#allocation5 + $0x28] sm:$0xff] }
  0x10   :  { %388 = vmatpush.msra.mxu2 %v90_v1  ;;  %389 = vmatpush.msra.mxu3 %v90_v1  ;;  %v80_v11 = vld [vmem:[#allocation5 + $0x20] sm:$0xff]  ;;  %v79_v12 = vld [vmem:[#allocation5 + $0x18] sm:$0xff]  ;;  %v78_v13 = vld [vmem:[#allocation5 + $0x10] sm:$0xff] }
  0x11   :  { %94 = vmatpush.msra.mxu0 %v89_v2  ;;  %390 = vmatpush.msra.mxu1 %v89_v2  ;;  %v77_v14 = vld [vmem:[#allocation5 + $0x8] sm:$0xff]  ;;  %v76_v15 = vld [vmem:[#allocation5] sm:$0xff]  ;;  %v46_v24 = vld [vmem:[#allocation2 + $0x10] sm:$0xff] }
  0x12   :  { %391 = vmatpush.msra.mxu2 %v89_v2  ;;  %392 = vmatpush.msra.mxu3 %v89_v2  ;;  %v44_v16 = vld [vmem:[#allocation2] sm:$0xff]  ;;  %v45_v20 = vld [vmem:[#allocation2 + $0x8] sm:$0xff]  ;;  %v54_v25 = vld [vmem:[#allocation2 + $0x50] sm:$0xff] }
  0x13   :  { %95 = vmatpush.msra.mxu0 %v88_v3  ;;  %393 = vmatpush.msra.mxu1 %v88_v3  ;;  %v52_v17 = vld [vmem:[#allocation2 + $0x40] sm:$0xff]  ;;  %v53_v21 = vld [vmem:[#allocation2 + $0x48] sm:$0xff]  ;;  %v62_v26 = vld [vmem:[#allocation2 + $0x90] sm:$0xff] }
  0x14   :  { %394 = vmatpush.msra.mxu2 %v88_v3  ;;  %395 = vmatpush.msra.mxu3 %v88_v3  ;;  %v60_v18 = vld [vmem:[#allocation2 + $0x80] sm:$0xff]  ;;  %v61_v22 = vld [vmem:[#allocation2 + $0x88] sm:$0xff]  ;;  %v70_v27 = vld [vmem:[#allocation2 + $0xd0] sm:$0xff] }
  0x15   :  { %96 = vmatpush.msra.mxu0 %v87_v4  ;;  %396 = vmatpush.msra.mxu1 %v87_v4  ;;  %v68_v19 = vld [vmem:[#allocation2 + $0xc0] sm:$0xff]  ;;  %v69_v23 = vld [vmem:[#allocation2 + $0xc8] sm:$0xff]  ;;  %v47_v28 = vld [vmem:[#allocation2 + $0x18] sm:$0xff] }
  0x16   :  { %397 = vmatpush.msra.mxu2 %v87_v4  ;;  %398 = vmatpush.msra.mxu3 %v87_v4  ;;  %v55_v29 = vld [vmem:[#allocation2 + $0x58] sm:$0xff]  ;;  %v48_v32 = vld [vmem:[#allocation2 + $0x20] sm:$0xff]  ;;  %v49_v36 = vld [vmem:[#allocation2 + $0x28] sm:$0xff] }
  0x17   :  { %97 = vmatpush.msra.mxu0 %v86_v5  ;;  %399 = vmatpush.msra.mxu1 %v86_v5  ;;  %v63_v30 = vld [vmem:[#allocation2 + $0x98] sm:$0xff]  ;;  %v56_v33 = vld [vmem:[#allocation2 + $0x60] sm:$0xff]  ;;  %v57_v37 = vld [vmem:[#allocation2 + $0x68] sm:$0xff] }
  0x18   :  { %400 = vmatpush.msra.mxu2 %v86_v5  ;;  %401 = vmatpush.msra.mxu3 %v86_v5  ;;  %v71_v31 = vld [vmem:[#allocation2 + $0xd8] sm:$0xff]  ;;  %v64_v34 = vld [vmem:[#allocation2 + $0xa0] sm:$0xff]  ;;  %v65_v38 = vld [vmem:[#allocation2 + $0xa8] sm:$0xff] }
  0x19   :  { %98 = vmatpush.msra.mxu0 %v85_v6  ;;  %402 = vmatpush.msra.mxu1 %v85_v6  ;;  %v72_v35 = vld [vmem:[#allocation2 + $0xe0] sm:$0xff]  ;;  %v73_v39 = vld [vmem:[#allocation2 + $0xe8] sm:$0xff]  ;;  %v50_v40 = vld [vmem:[#allocation2 + $0x30] sm:$0xff] }
  0x1a   :  { %403 = vmatpush.msra.mxu2 %v85_v6  ;;  %404 = vmatpush.msra.mxu3 %v85_v6  ;;  %v58_v41 = vld [vmem:[#allocation2 + $0x70] sm:$0xff]  ;;  %v51_v44 = vld [vmem:[#allocation2 + $0x38] sm:$0xff] }
  0x1b   :  { %99 = vmatpush.msra.mxu0 %v84_v7  ;;  %405 = vmatpush.msra.mxu1 %v84_v7  ;;  %v66_v42 = vld [vmem:[#allocation2 + $0xb0] sm:$0xff]  ;;  %v59_v45 = vld [vmem:[#allocation2 + $0x78] sm:$0xff] }
  0x1c   :  { %406 = vmatpush.msra.mxu2 %v84_v7  ;;  %407 = vmatpush.msra.mxu3 %v84_v7  ;;  %v74_v43 = vld [vmem:[#allocation2 + $0xf0] sm:$0xff]  ;;  %v67_v46 = vld [vmem:[#allocation2 + $0xb8] sm:$0xff] }
  0x1d   :  { %100 = vmatpush.msra.mxu0 %v83_v8  ;;  %408 = vmatpush.msra.mxu1 %v83_v8  ;;  %v75_v47 = vld [vmem:[#allocation2 + $0xf8] sm:$0xff] }
  0x1e   :  { %409 = vmatpush.msra.mxu2 %v83_v8  ;;  %410 = vmatpush.msra.mxu3 %v83_v8 }
  0x1f   :  { %101 = vmatpush.msra.mxu0 %v82_v9  ;;  %411 = vmatpush.msra.mxu1 %v82_v9 }
  0x20   :  { %412 = vmatpush.msra.mxu2 %v82_v9  ;;  %413 = vmatpush.msra.mxu3 %v82_v9 }
  0x21   :  { %102 = vmatpush.msra.mxu0 %v81_v10  ;;  %414 = vmatpush.msra.mxu1 %v81_v10 }
  0x22   :  { %415 = vmatpush.msra.mxu2 %v81_v10  ;;  %416 = vmatpush.msra.mxu3 %v81_v10 }
  0x23   :  { %103 = vmatpush.msra.mxu0 %v80_v11  ;;  %417 = vmatpush.msra.mxu1 %v80_v11 }
  0x24   :  { %418 = vmatpush.msra.mxu2 %v80_v11  ;;  %419 = vmatpush.msra.mxu3 %v80_v11 }
  0x25   :  { %104 = vmatpush.msra.mxu0 %v79_v12  ;;  %420 = vmatpush.msra.mxu1 %v79_v12 }
  0x26   :  { %421 = vmatpush.msra.mxu2 %v79_v12  ;;  %422 = vmatpush.msra.mxu3 %v79_v12 }
  0x27   :  { %105 = vmatpush.msra.mxu0 %v78_v13  ;;  %423 = vmatpush.msra.mxu1 %v78_v13 }
  0x28   :  { %424 = vmatpush.msra.mxu2 %v78_v13  ;;  %425 = vmatpush.msra.mxu3 %v78_v13 }
  0x29   :  { %106 = vmatpush.msra.mxu0 %v77_v14  ;;  %426 = vmatpush.msra.mxu1 %v77_v14 }
  0x2a   :  { %427 = vmatpush.msra.mxu2 %v77_v14  ;;  %428 = vmatpush.msra.mxu3 %v77_v14 }
  0x2b   :  { %107 = vmatpush.msra.mxu0 %v76_v15  ;;  %429 = vmatpush.msra.mxu1 %v76_v15 }
  0x2c   :  { %430 = vmatpush.msra.mxu2 %v76_v15  ;;  %431 = vmatpush.msra.mxu3 %v76_v15 }
  0x2d   :  { %108 = vmatmul.f32.vlgmr.msra.gmra.mxu0 %v44_v16  ;;  %132 = vmatmul.f32.vlgmr.msra.gmra.mxu1 %v52_v17 }
  0x2e   :  { %156 = vmatmul.f32.vlgmr.msra.gmra.mxu2 %v60_v18  ;;  %180 = vmatmul.f32.vlgmr.msra.gmra.mxu3 %v68_v19 }
  0x35   :  { %111 = vmatmul.f32.gmra.mxu0 %v45_v20  ;;  %135 = vmatmul.f32.gmra.mxu1 %v53_v21 }
  0x36   :  { %159 = vmatmul.f32.gmra.mxu2 %v61_v22  ;;  %183 = vmatmul.f32.gmra.mxu3 %v69_v23 }
  0x3d   :  { %114 = vmatmul.f32.gmra.mxu0 %v46_v24  ;;  %138 = vmatmul.f32.gmra.mxu1 %v54_v25 }
  0x3e   :  { %162 = vmatmul.f32.gmra.mxu2 %v62_v26  ;;  %186 = vmatmul.f32.gmra.mxu3 %v70_v27 }
  0x45   :  { %117 = vmatmul.f32.gmra.mxu0 %v47_v28  ;;  %141 = vmatmul.f32.gmra.mxu1 %v55_v29 }
  0x46   :  { %165 = vmatmul.f32.gmra.mxu2 %v63_v30  ;;  %189 = vmatmul.f32.gmra.mxu3 %v71_v31 }
  0x4d   :  { %120 = vmatmul.f32.gmra.mxu0 %v48_v32  ;;  %144 = vmatmul.f32.gmra.mxu1 %v56_v33 }
  0x4e   :  { %168 = vmatmul.f32.gmra.mxu2 %v64_v34  ;;  %192 = vmatmul.f32.gmra.mxu3 %v72_v35 }
  0x55   :  { %123 = vmatmul.f32.gmra.mxu0 %v49_v36  ;;  %147 = vmatmul.f32.gmra.mxu1 %v57_v37 }
  0x56   :  { %171 = vmatmul.f32.gmra.mxu2 %v65_v38  ;;  %195 = vmatmul.f32.gmra.mxu3 %v73_v39 }
  0x5d   :  { %126 = vmatmul.f32.gmra.mxu0 %v50_v40  ;;  %150 = vmatmul.f32.gmra.mxu1 %v58_v41 }
  0x5e   :  { %174 = vmatmul.f32.gmra.mxu2 %v66_v42  ;;  %198 = vmatmul.f32.gmra.mxu3 %v74_v43 }
  0x65   :  { %129 = vmatmul.f32.gmra.mxu0 %v51_v44  ;;  %153 = vmatmul.f32.gmra.mxu1 %v59_v45 }
  0x66   :  { %177 = vmatmul.f32.gmra.mxu2 %v67_v46  ;;  %201 = vmatmul.f32.gmra.mxu3 %v75_v47 }
  0xaa   :  { %v109_v48 = vpop.f32.mrf.mxu0  ;;  %v133_v49 = vpop.f32.mrf.mxu1 }
  0xb1   :  { %v157_v50 = vpop.f32.mrf.mxu2  ;;  %v181_v51 = vpop.f32.mrf.mxu3 }
  0xb2   :  { %v112_v52 = vpop.f32.mrf.mxu0  ;;  %v136_v53 = vpop.f32.mrf.mxu1 }
  0xb3   :  { %v292_v54 = vpack.c.bf16 %v112_v52, %v109_v48  ;;  %v312_v55 = vpack.c.bf16 %v136_v53, %v133_v49 }
  0xb5   :  { %293 = vst [vmem:[#allocation7] sm:$0xff] %v292_v54  }
  0xb6   :  { %372 = vst [vmem:[#allocation7 + $0x20] sm:$0xff] %v312_v55  }
  0xb9   :  { %v160_v56 = vpop.f32.mrf.mxu2  ;;  %v184_v57 = vpop.f32.mrf.mxu3 }
  0xba   :  { %v332_v58 = vpack.c.bf16 %v160_v56, %v157_v50  ;;  %v352_v59 = vpack.c.bf16 %v184_v57, %v181_v51  ;;  %v115_v60 = vpop.f32.mrf.mxu0  ;;  %v139_v61 = vpop.f32.mrf.mxu1 }
  0xbc   :  { %376 = vst [vmem:[#allocation7 + $0x40] sm:$0xff] %v332_v58  }
  0xbd   :  { %380 = vst [vmem:[#allocation7 + $0x60] sm:$0xff] %v352_v59  }
  0xc1   :  { %v163_v62 = vpop.f32.mrf.mxu2  ;;  %v187_v63 = vpop.f32.mrf.mxu3 }
  0xc2   :  { %v118_v0 = vpop.f32.mrf.mxu0  ;;  %v142_v1 = vpop.f32.mrf.mxu1 }
  0xc3   :  { %v297_v2 = vpack.c.bf16 %v118_v0, %v115_v60  ;;  %v317_v3 = vpack.c.bf16 %v142_v1, %v139_v61 }
  0xc5   :  { %369 = vst [vmem:[#allocation7 + $0x8] sm:$0xff] %v297_v2  }
  0xc6   :  { %373 = vst [vmem:[#allocation7 + $0x28] sm:$0xff] %v317_v3  }
  0xc9   :  { %v166_v4 = vpop.f32.mrf.mxu2  ;;  %v190_v5 = vpop.f32.mrf.mxu3 }
  0xca   :  { %v337_v6 = vpack.c.bf16 %v166_v4, %v163_v62  ;;  %v357_v7 = vpack.c.bf16 %v190_v5, %v187_v63  ;;  %v121_v8 = vpop.f32.mrf.mxu0  ;;  %v145_v9 = vpop.f32.mrf.mxu1 }
  0xcc   :  { %377 = vst [vmem:[#allocation7 + $0x48] sm:$0xff] %v337_v6  }
  0xcd   :  { %381 = vst [vmem:[#allocation7 + $0x68] sm:$0xff] %v357_v7  }
  0xd1   :  { %v169_v10 = vpop.f32.mrf.mxu2  ;;  %v193_v11 = vpop.f32.mrf.mxu3 }
  0xd2   :  { %v124_v12 = vpop.f32.mrf.mxu0  ;;  %v148_v13 = vpop.f32.mrf.mxu1 }
  0xd3   :  { %v302_v14 = vpack.c.bf16 %v124_v12, %v121_v8  ;;  %v322_v15 = vpack.c.bf16 %v148_v13, %v145_v9 }
  0xd5   :  { %370 = vst [vmem:[#allocation7 + $0x10] sm:$0xff] %v302_v14  }
  0xd6   :  { %374 = vst [vmem:[#allocation7 + $0x30] sm:$0xff] %v322_v15  }
  0xd9   :  { %v172_v16 = vpop.f32.mrf.mxu2  ;;  %v196_v17 = vpop.f32.mrf.mxu3 }
  0xda   :  { %v342_v18 = vpack.c.bf16 %v172_v16, %v169_v10  ;;  %v362_v19 = vpack.c.bf16 %v196_v17, %v193_v11  ;;  %v127_v20 = vpop.f32.mrf.mxu0  ;;  %v151_v21 = vpop.f32.mrf.mxu1 }
  0xdc   :  { %378 = vst [vmem:[#allocation7 + $0x50] sm:$0xff] %v342_v18  }
  0xdd   :  { %382 = vst [vmem:[#allocation7 + $0x70] sm:$0xff] %v362_v19  }
  0xe1   :  { %v175_v22 = vpop.f32.mrf.mxu2  ;;  %v199_v23 = vpop.f32.mrf.mxu3 }
  0xe2   :  { %v130_v24 = vpop.f32.mrf.mxu0  ;;  %v154_v25 = vpop.f32.mrf.mxu1 }
  0xe3   :  { %v307_v26 = vpack.c.bf16 %v130_v24, %v127_v20  ;;  %v327_v27 = vpack.c.bf16 %v154_v25, %v151_v21 }
  0xe5   :  { %371 = vst [vmem:[#allocation7 + $0x18] sm:$0xff] %v307_v26  }
  0xe6   :  { %375 = vst [vmem:[#allocation7 + $0x38] sm:$0xff] %v327_v27  }
  0xe9   :  { %v178_v28 = vpop.f32.mrf.mxu2  ;;  %v202_v29 = vpop.f32.mrf.mxu3 }
  0xea   :  { %v347_v30 = vpack.c.bf16 %v178_v28, %v175_v22  ;;  %v367_v31 = vpack.c.bf16 %v202_v29, %v199_v23 }
  0xec   :  { %379 = vst [vmem:[#allocation7 + $0x58] sm:$0xff] %v347_v30  }
  0xed   :  { %383 = vst [vmem:[#allocation7 + $0x78] sm:$0xff] %v367_v31  }
  0xee   :  { %281 = dma.vmem_to_hbm [thread:$0]  %s274_s1, 2048, %s276_s23, [#allocation4], %s522_s24, %s522_s24, %s523_s25  }
  0xef   :  { %515 = dma.done.wait [#allocation4], 2048  }
  0xf0   :  { %516 = vsyncadd [#allocation4], 4294965248 }
  0xf1   :  { %286 = vsyncpa [#allocation3], 1 }
  0xf2   :  { %287 = vsyncpa [#allocation6], 1 }
  0xf3   :  { %288 = vsyncpa [#allocation4], 1 }

</bundles_post_ra>
